<compile_context>
chip_gen: v5e
topology: v5e:2x2
jax: 0.10.0
libtpu: 0.0.40
codegen_flags: <defaults>
</compile_context>

<pallas_src>
import jax
import jax.numpy as jnp
from jax.experimental import pallas as pl
from jax.experimental.pallas import tpu as pltpu


def linear_cols_kernel(w_ref, b_ref, x_ref, o_ref):
    # out_tile = W @ x_tile + b (bias broadcast over columns); f32 accumulation.
    acc = jnp.dot(w_ref[...], x_ref[...], preferred_element_type=jnp.float32)
    o_ref[...] = (acc + b_ref[...]).astype(o_ref.dtype)


def _pick_column_tile(n, in_dim, out_dim, itemsize):
    """Largest lane-dense column tile that (a) keeps the double-buffered x+out
    tiles under ~8 MiB of VMEM and (b) leaves >= 2 grid steps when n spans more
    than one 128-lane tile (so v7x's 2 TensorCores both get work)."""
    if n <= 128:
        return n  # single full-extent tile; last dim == array dim is allowed
    tile_budget = 8 << 20                                     # ~25% of 32 MiB scoped VMEM
    per_128_cols = 2 * (in_dim + out_dim) * itemsize * 128    # dbl-buffered x+out bytes
    tn_vmem = 128 * max(1, tile_budget // per_128_cols)
    n128 = pl.cdiv(n, 128)
    tn_split = 128 * pl.cdiv(n128, 2)                         # force grid >= 2 (v7x)
    return int(min(tn_vmem, tn_split))


def test_model_forward(x, weight, bias):
    """x: (in_dim, N); weight: (out_dim, in_dim); bias: (out_dim,) -> (out_dim, N)."""
    out_dim, in_dim = weight.shape
    n = x.shape[-1]
    itemsize = jnp.dtype(x.dtype).itemsize

    tn = _pick_column_tile(n, in_dim, out_dim, itemsize)
    grid = (pl.cdiv(n, tn),)  # ragged last tile handled (masked) by Pallas

    # Glue in plain JAX: bias as an f32 column (tiny, resident in VMEM).
    b2d = bias.reshape(out_dim, 1).astype(jnp.float32)

    # True VMEM footprint: default double-buffering on every operand, 2x headroom.
    w_bytes = out_dim * in_dim * itemsize
    b_bytes = out_dim * 4
    x_tile_bytes = in_dim * tn * itemsize
    o_tile_bytes = out_dim * tn * itemsize
    need = 2 * (w_bytes + b_bytes + x_tile_bytes + o_tile_bytes)
    vmem_limit = int(min(max(2 * need, 4 << 20), 32 << 20))

    cost = pl.CostEstimate(
        flops=2 * out_dim * in_dim * n,
        transcendentals=0,
        bytes_accessed=w_bytes + b_bytes + (in_dim + out_dim) * n * itemsize,
    )

    return pl.pallas_call(
        linear_cols_kernel,
        out_shape=jax.ShapeDtypeStruct((out_dim, n), x.dtype),
        grid_spec=pl.GridSpec(
            grid=grid,
            in_specs=[
                pl.BlockSpec((out_dim, in_dim), lambda j: (0, 0)),  # W (resident)
                pl.BlockSpec((out_dim, 1), lambda j: (0, 0)),       # bias (resident)
                pl.BlockSpec((in_dim, tn), lambda j: (0, j)),       # x column tile
            ],
            out_specs=pl.BlockSpec((out_dim, tn), lambda j: (0, j)),
        ),
        compiler_params=pltpu.CompilerParams(
            dimension_semantics=("parallel",),
            vmem_limit_bytes=vmem_limit,
        ),
        cost_estimate=cost,
    )(weight, b2d, x)


if __name__ == "__main__":
    key = jax.random.PRNGKey(0)
    in_dim, out_dim, n = 32, 16, 8  # small shapes: hidden=32, out=16, seq(cols)=8
    kw, kb, kx = jax.random.split(key, 3)

    # Deterministic init mimicking nn.Linear default U(-1/sqrt(in_dim), 1/sqrt(in_dim))
    bound = 1.0 / float(jnp.sqrt(jnp.float32(in_dim)))
    weight = jax.random.uniform(kw, (out_dim, in_dim), jnp.float32, -bound, bound)
    bias = jax.random.uniform(kb, (out_dim,), jnp.float32, -bound, bound)
    x = jax.random.normal(kx, (in_dim, n), jnp.float32)

    out = test_model_forward(x, weight, bias)
    jax.block_until_ready(out)
    ref = weight @ x + bias[:, None]
    assert out.shape == (out_dim, n)
    assert jnp.allclose(out, ref, atol=1e-5, rtol=1e-5), "mismatch vs reference (n=8)"

    # Also exercise the multi-tile / ragged-last-tile path (no wrapper pad or slice).
    x2 = jax.random.normal(jax.random.PRNGKey(1), (in_dim, 300), jnp.float32)
    out2 = test_model_forward(x2, weight, bias)
    jax.block_until_ready(out2)
    ref2 = weight @ x2 + bias[:, None]
    assert out2.shape == (out_dim, 300)
    assert jnp.allclose(out2, ref2, atol=1e-5, rtol=1e-5), "mismatch vs reference (n=300)"

    print("KERNEL_OK")
</pallas_src>

<mosaic_0001>
module attributes {stable_mosaic.version = 11 : i64} {
  func.func @linear_cols_kernel(%arg0: i32, %arg1: memref<16x32xf32, #tpu.memory_space<vmem>>, %arg2: memref<16x1xf32, #tpu.memory_space<vmem>>, %arg3: memref<32x8xf32, #tpu.memory_space<vmem>>, %arg4: memref<16x8xf32, #tpu.memory_space<vmem>>) attributes {dimension_semantics = [#tpu.dimension_semantics<parallel>], iteration_bounds = array<i64: 1>, scalar_prefetch = 0 : i64, scratch_operands = 0 : i64, tpu.core_type = #tpu.core_type<tc>, window_params = [{pipeline_mode = #tpu.pipeline_mode<synchronous>, transform_indices = @transform_0, window_bounds = array<i64: 16, 32>}, {pipeline_mode = #tpu.pipeline_mode<synchronous>, transform_indices = @transform_1, window_bounds = array<i64: 16, 1>}, {transform_indices = @transform_2, window_bounds = array<i64: 32, 8>}, {transform_indices = @transform_3, window_bounds = array<i64: 16, 8>}]} {
    %c0 = arith.constant 0 : index
    %c0_0 = arith.constant 0 : index
    %0 = vector.load %arg1[%c0, %c0_0] : memref<16x32xf32, #tpu.memory_space<vmem>>, vector<16x32xf32>
    %c0_1 = arith.constant 0 : index
    %c0_2 = arith.constant 0 : index
    %1 = vector.load %arg3[%c0_1, %c0_2] : memref<32x8xf32, #tpu.memory_space<vmem>>, vector<32x8xf32>
    %cst = arith.constant dense<0.000000e+00> : vector<16x8xf32>
    %2 = tpu.matmul %0, %1, %cst {dimension_numbers = #tpu.dot_dimension_numbers<[1], [0], [0], [1], [0, 0, 1, 1], [], []>} : vector<16x32xf32>, vector<32x8xf32>, vector<16x8xf32> -> vector<16x8xf32>
    %c0_3 = arith.constant 0 : index
    %c0_4 = arith.constant 0 : index
    %3 = vector.load %arg2[%c0_3, %c0_4] : memref<16x1xf32, #tpu.memory_space<vmem>>, vector<16x1xf32>
    %4 = vector.broadcast %3 : vector<16x1xf32> to vector<16x8xf32>
    %5 = arith.addf %2, %4 : vector<16x8xf32>
    %c0_5 = arith.constant 0 : index
    %c0_6 = arith.constant 0 : index
    %6 = vector.load %arg4[%c0_5, %c0_6] : memref<16x8xf32, #tpu.memory_space<vmem>>, vector<16x8xf32>
    tpu.vector_store %arg4[%c0_5, %c0_6], %5 {strides = array<i32>} : memref<16x8xf32, #tpu.memory_space<vmem>>, vector<16x8xf32>,
    return
  }
  func.func @transform_0(%arg0: i32) -> (i32, i32) {
    %c0_i32 = arith.constant 0 : i32
    %c0_i32_0 = arith.constant 0 : i32
    %c0_i32_1 = arith.constant 0 : i32
    return %c0_i32, %c0_i32_0 : i32, i32
  }
  func.func @transform_1(%arg0: i32) -> (i32, i32) {
    %c0_i32 = arith.constant 0 : i32
    %c0_i32_0 = arith.constant 0 : i32
    %c0_i32_1 = arith.constant 0 : i32
    return %c0_i32, %c0_i32_0 : i32, i32
  }
  func.func @transform_2(%arg0: i32) -> (i32, i32) {
    %c0_i32 = arith.constant 0 : i32
    %c0_i32_0 = arith.constant 0 : i32
    return %c0_i32, %arg0 : i32, i32
  }
  func.func @transform_3(%arg0: i32) -> (i32, i32) {
    %c0_i32 = arith.constant 0 : i32
    %c0_i32_0 = arith.constant 0 : i32
    return %c0_i32, %arg0 : i32, i32
  }
}

</mosaic_0001>

<bundles_post_ra>
// kernel: tpu_custom_call.1
= control target key start
LH: loop header
LB: loop body
LE: loop exit
PB: predicated region body
PF: predicated region fallthrough
CT: control target
= control target key end

     0   :  { %v77_v1 = vmov 0   ;;  %vm32_vm0 = vcmask 261120   ;;  %vm62_vm1 = vcmask 64512   ;;  %s128_s2 = inlined_call_operand.vmem [shape: f32[32,8], index: 2, kind: input, shape index: {}]   ;;  %s129_s1 = inlined_call_operand.vmem [shape: f32[16,1], index: 1, kind: input, shape index: {}]   ;;  %s130_s0 = inlined_call_operand.vmem [shape: f32[16,32], index: 0, kind: input, shape index: {}]   ;;  %s131_s3 = inlined_call_operand.vmem [shape: f32[16,8], index: 3, kind: output, shape index: {}]  }
   0x1   :  { %v19_v0 = vld [vmem:[%s128_s2 + $0x18] sm:$0xff]  ;;  %76 = vset.pattern.permute.xlu0 %v77_v1  ;;  %v18_v2 = vld [vmem:[%s128_s2 + $0x10] sm:$0xff]  ;;  %v20_v3 = vld [vmem:[%s129_s1] sm:$0xff] }
   0x2   :  { %51 = vmatpush.msra.mxu0 %v19_v0  ;;  %71 = vmatpush.msra.mxu1 %v19_v0  ;;  %v17_v4 = vld [vmem:[%s128_s2 + $0x8] sm:$0xff]  ;;  %v16_v5 = vld [vmem:[%s128_s2] sm:$0xff] }
   0x3   :  { %24 = vperm.xlu0 %76, %v20_v3   ;;  %v14_v6 = vld [vmem:[%s130_s0] sm:$0xff]  ;;  %v15_v7 = vld [vmem:[%s130_s0 + $0x8] sm:$0xff] }
   0x4   :  { %52 = vmatpush.msra.mxu0 %v18_v2  ;;  %72 = vmatpush.msra.mxu1 %v18_v2  ;;  %v21_v8 = vld [vmem:[%s129_s1 + $0x8] sm:$0xff] }
   0x6   :  { %53 = vmatpush.msra.mxu0 %v17_v4  ;;  %73 = vmatpush.msra.mxu1 %v17_v4 }
   0x8   :  { %54 = vmatpush.msra.mxu0 %v16_v5  ;;  %74 = vmatpush.msra.mxu1 %v16_v5 }
   0x9   :  { %69 = vmatmul.msk.f32.vlgmr.msra.gmra.mxu0 %vm32_vm0, %v14_v6  ;;  %70 = vmatmul.msk.f32.vlgmr.msra.gmra.mxu1 %vm32_vm0, %v15_v7 }
   0xb   :  { %29 = vperm.xlu0 %76, %v21_v8  }
  0x75   :  { %v25_v9 = vpop.permute.xlu0 %24 }
  0x7d   :  { %v30_v10 = vpop.permute.xlu0 %29 }
  0x86   :  { %v56_v11 = vpop.f32.mrf.mxu0  ;;  %v59_v12 = vpop.f32.mrf.mxu1 }
  0x87   :  { %v57_v13 = vadd.f32 %v56_v11, %v25_v9  ;;  %v60_v14 = vadd.f32 %v59_v12, %v30_v10 }
  0x89   :  { %63 = vst.msk [vmem:[%s131_s3] sm:$0xff] %vm62_vm1, %v57_v13 }
  0x8a   :  { %64 = vst.msk [vmem:[%s131_s3 + $0x8] sm:$0xff] %vm62_vm1, %v60_v14 }

</bundles_post_ra>
